<compile_context>
chip_gen: v6e
topology: v6e:2x2x1
jax: 0.10.0
libtpu: 0.0.40
codegen_flags: <defaults>
</compile_context>

<pallas_src>
import math

import jax
import jax.numpy as jnp
from jax.experimental import pallas as pl
from jax.experimental.pallas import tpu as pltpu


def fcnn_kernel(x_ref, w1_ref, b1_ref, w2_ref, b2_ref, w3_ref, b3_ref, o_ref):
    # Fused MLP: MXU matmuls with f32 accumulation, bias add on the VPU,
    # tanh on the EUP.  h1/h2 never leave vregs/VMEM.
    cdt = w1_ref.dtype  # f32 (default) or bf16 (opt-in); casts are no-ops for f32
    h1 = jnp.tanh(
        jnp.dot(x_ref[...].astype(cdt), w1_ref[...],
                preferred_element_type=jnp.float32) + b1_ref[...]
    )
    h2 = jnp.tanh(
        jnp.dot(h1.astype(cdt), w2_ref[...],
                preferred_element_type=jnp.float32) + b2_ref[...]
    )
    o_ref[...] = (
        jnp.dot(h2.astype(cdt), w3_ref[...],
                preferred_element_type=jnp.float32) + b3_ref[...]
    ).astype(o_ref.dtype)


def _round_up(v, m):
    return (v + m - 1) // m * m


def fcnn_forward(x, w1, b1, w2, b2, w3, b3, *, block_m=2048, use_bf16_matmul=False):
    """y = tanh(tanh(x@W1+b1)@W2+b2)@W3+b3 ; weights stored (fan_in, fan_out)."""
    x = x.astype(jnp.float32)  # matches `x.float()` in the PyTorch module
    in_dim = x.shape[-1]
    hid = w1.shape[1]
    out_dim = w3.shape[1]

    lead_shape = x.shape[:-1]
    x2 = x.reshape(-1, in_dim)
    m = x2.shape[0]

    # Row tile: large to amortize the ~0.35us/grid-step overhead, 8-sublane
    # aligned, and <= ceil(m/2) when m >= 16 so the "parallel" batch axis has
    # at least 2 steps (v7x 2-TC split, plus actual pipelining).
    bm = max(8, min(block_m, _round_up(m, 8)))
    if m >= 16:
        bm = min(bm, _round_up(pl.cdiv(m, 2), 8))
    grid = (pl.cdiv(m, bm),)

    w_dtype = jnp.bfloat16 if use_bf16_matmul else jnp.float32
    w1c = w1.astype(w_dtype)
    w2c = w2.astype(w_dtype)
    w3c = w3.astype(w_dtype)
    b1c = b1.astype(jnp.float32).reshape(1, hid)
    b2c = b2.astype(jnp.float32).reshape(1, hid)
    b3c = b3.astype(jnp.float32).reshape(1, out_dim)

    # Weights/biases are grid-invariant (constant index_map -> fetched once,
    # stay resident in VMEM).  Single-buffer them once they're big enough that
    # the pipeline's second copy would matter for v7x's 64 MiB VMEM.
    w_elem = 2 if use_bf16_matmul else 4
    weight_bytes = (in_dim * hid + hid * hid + hid * out_dim) * w_elem
    single_buffer_weights = weight_bytes > (2 << 20)
    const = lambda i: (0, 0)

    def wspec(shape):
        if single_buffer_weights:
            return pl.BlockSpec(shape, const, pipeline_mode=pl.Buffered(1))
        return pl.BlockSpec(shape, const)

    # Scoped-VMEM budget from the real working set (pipeline-buffered blocks
    # plus in-kernel h1/h2 activations), clamped well under v7x's 64 MiB.
    w_bufs = 1 if single_buffer_weights else 2
    footprint = (
        2 * bm * in_dim * 4            # x block, double-buffered
        + 2 * bm * out_dim * 4         # out block, double-buffered
        + w_bufs * weight_bytes        # W1/W2/W3
        + w_bufs * (2 * hid + out_dim) * 4  # biases (f32)
        + 2 * bm * hid * 4             # h1 / h2 f32 activations
        + bm * max(hid, out_dim) * 4   # matmul result staging margin
    )
    vmem_limit = int(min(max(int(1.5 * footprint) + (2 << 20), 16 << 20), 48 << 20))

    y = pl.pallas_call(
        fcnn_kernel,
        out_shape=jax.ShapeDtypeStruct((m, out_dim), jnp.float32),
        grid=grid,
        in_specs=[
            pl.BlockSpec((bm, in_dim), lambda i: (i, 0)),  # x: streamed over batch
            wspec((in_dim, hid)),                          # W1 (resident)
            wspec((1, hid)),                               # b1
            wspec((hid, hid)),                             # W2
            wspec((1, hid)),                               # b2
            wspec((hid, out_dim)),                         # W3
            wspec((1, out_dim)),                           # b3
        ],
        out_specs=pl.BlockSpec((bm, out_dim), lambda i: (i, 0)),
        compiler_params=pltpu.CompilerParams(
            dimension_semantics=("parallel",),  # batch axis -> megacore sharding
            vmem_limit_bytes=vmem_limit,
        ),
    )(x2, w1c, b1c, w2c, b2c, w3c, b3c)

    return y.reshape(lead_shape + (out_dim,))


def fcnn_reference(x, w1, b1, w2, b2, w3, b3):
    # Pure-JAX reference mirroring the PyTorch module exactly.
    x = x.astype(jnp.float32)
    h1 = jnp.tanh(x @ w1 + b1)
    h2 = jnp.tanh(h1 @ w2 + b2)
    return h2 @ w3 + b3


if __name__ == "__main__":
    batch, in_dim, hidden_dim, out_dim = 16, 8, 32, 4

    key = jax.random.PRNGKey(0)
    keys = jax.random.split(key, 7)

    # PyTorch nn.Linear default init: U(-1/sqrt(fan_in), 1/sqrt(fan_in)).
    def linear_init(kw, kb, fan_in, fan_out):
        bound = 1.0 / math.sqrt(fan_in)
        w = jax.random.uniform(kw, (fan_in, fan_out), jnp.float32, -bound, bound)
        b = jax.random.uniform(kb, (fan_out,), jnp.float32, -bound, bound)
        return w, b

    w1, b1 = linear_init(keys[0], keys[1], in_dim, hidden_dim)
    w2, b2 = linear_init(keys[2], keys[3], hidden_dim, hidden_dim)
    w3, b3 = linear_init(keys[4], keys[5], hidden_dim, out_dim)
    x = jax.random.normal(keys[6], (batch, in_dim), jnp.float32)

    y = fcnn_forward(x, w1, b1, w2, b2, w3, b3)
    jax.block_until_ready(y)

    y_ref = fcnn_reference(x, w1, b1, w2, b2, w3, b3)
    assert y.shape == (batch, out_dim)
    assert jnp.allclose(y, y_ref, atol=1e-5, rtol=1e-5)

    print("KERNEL_OK")
</pallas_src>

<mosaic_0001>
module attributes {stable_mosaic.version = 11 : i64} {
  func.func @fcnn_kernel(%arg0: i32, %arg1: memref<8x8xf32, #tpu.memory_space<vmem>>, %arg2: memref<8x32xf32, #tpu.memory_space<vmem>>, %arg3: memref<1x32xf32, #tpu.memory_space<vmem>>, %arg4: memref<32x32xf32, #tpu.memory_space<vmem>>, %arg5: memref<1x32xf32, #tpu.memory_space<vmem>>, %arg6: memref<32x4xf32, #tpu.memory_space<vmem>>, %arg7: memref<1x4xf32, #tpu.memory_space<vmem>>, %arg8: memref<8x4xf32, #tpu.memory_space<vmem>>) attributes {dimension_semantics = [#tpu.dimension_semantics<parallel>], iteration_bounds = array<i64: 2>, scalar_prefetch = 0 : i64, scratch_operands = 0 : i64, tpu.core_type = #tpu.core_type<tc>, window_params = [{transform_indices = @transform_0, window_bounds = array<i64: 8, 8>}, {pipeline_mode = #tpu.pipeline_mode<synchronous>, transform_indices = @transform_1, window_bounds = array<i64: 8, 32>}, {pipeline_mode = #tpu.pipeline_mode<synchronous>, transform_indices = @transform_2, window_bounds = array<i64: 1, 32>}, {pipeline_mode = #tpu.pipeline_mode<synchronous>, transform_indices = @transform_3, window_bounds = array<i64: 32, 32>}, {pipeline_mode = #tpu.pipeline_mode<synchronous>, transform_indices = @transform_4, window_bounds = array<i64: 1, 32>}, {pipeline_mode = #tpu.pipeline_mode<synchronous>, transform_indices = @transform_5, window_bounds = array<i64: 32, 4>}, {pipeline_mode = #tpu.pipeline_mode<synchronous>, transform_indices = @transform_6, window_bounds = array<i64: 1, 4>}, {transform_indices = @transform_7, window_bounds = array<i64: 8, 4>}]} {
    %c0 = arith.constant 0 : index
    %c0_0 = arith.constant 0 : index
    %0 = vector.load %arg1[%c0, %c0_0] : memref<8x8xf32, #tpu.memory_space<vmem>>, vector<8x8xf32>
    %c0_1 = arith.constant 0 : index
    %c0_2 = arith.constant 0 : index
    %1 = vector.load %arg2[%c0_1, %c0_2] : memref<8x32xf32, #tpu.memory_space<vmem>>, vector<8x32xf32>
    %cst = arith.constant dense<0.000000e+00> : vector<8x32xf32>
    %2 = tpu.matmul %0, %1, %cst {dimension_numbers = #tpu.dot_dimension_numbers<[1], [0], [0], [1], [0, 0, 1, 1], [], []>} : vector<8x8xf32>, vector<8x32xf32>, vector<8x32xf32> -> vector<8x32xf32>
    %c0_3 = arith.constant 0 : index
    %c0_4 = arith.constant 0 : index
    %3 = vector.load %arg3[%c0_3, %c0_4] : memref<1x32xf32, #tpu.memory_space<vmem>>, vector<1x32xf32>
    %4 = vector.broadcast %3 : vector<1x32xf32> to vector<8x32xf32>
    %5 = arith.addf %2, %4 : vector<8x32xf32>
    %6 = math.tanh %5 : vector<8x32xf32>
    %c0_5 = arith.constant 0 : index
    %c0_6 = arith.constant 0 : index
    %7 = vector.load %arg4[%c0_5, %c0_6] : memref<32x32xf32, #tpu.memory_space<vmem>>, vector<32x32xf32>
    %cst_7 = arith.constant dense<0.000000e+00> : vector<8x32xf32>
    %8 = tpu.matmul %6, %7, %cst_7 {dimension_numbers = #tpu.dot_dimension_numbers<[1], [0], [0], [1], [0, 0, 1, 1], [], []>} : vector<8x32xf32>, vector<32x32xf32>, vector<8x32xf32> -> vector<8x32xf32>
    %c0_8 = arith.constant 0 : index
    %c0_9 = arith.constant 0 : index
    %9 = vector.load %arg5[%c0_8, %c0_9] : memref<1x32xf32, #tpu.memory_space<vmem>>, vector<1x32xf32>
    %10 = vector.broadcast %9 : vector<1x32xf32> to vector<8x32xf32>
    %11 = arith.addf %8, %10 : vector<8x32xf32>
    %12 = math.tanh %11 : vector<8x32xf32>
    %c0_10 = arith.constant 0 : index
    %c0_11 = arith.constant 0 : index
    %13 = vector.load %arg6[%c0_10, %c0_11] : memref<32x4xf32, #tpu.memory_space<vmem>>, vector<32x4xf32>
    %cst_12 = arith.constant dense<0.000000e+00> : vector<8x4xf32>
    %14 = tpu.matmul %12, %13, %cst_12 {dimension_numbers = #tpu.dot_dimension_numbers<[1], [0], [0], [1], [0, 0, 1, 1], [], []>} : vector<8x32xf32>, vector<32x4xf32>, vector<8x4xf32> -> vector<8x4xf32>
    %c0_13 = arith.constant 0 : index
    %c0_14 = arith.constant 0 : index
    %15 = vector.load %arg7[%c0_13, %c0_14] : memref<1x4xf32, #tpu.memory_space<vmem>>, vector<1x4xf32>
    %16 = vector.broadcast %15 : vector<1x4xf32> to vector<8x4xf32>
    %17 = arith.addf %14, %16 : vector<8x4xf32>
    %c0_15 = arith.constant 0 : index
    %c0_16 = arith.constant 0 : index
    %18 = vector.load %arg8[%c0_15, %c0_16] : memref<8x4xf32, #tpu.memory_space<vmem>>, vector<8x4xf32>
    tpu.vector_store %arg8[%c0_15, %c0_16], %17 {strides = array<i32>} : memref<8x4xf32, #tpu.memory_space<vmem>>, vector<8x4xf32>,
    return
  }
  func.func @transform_0(%arg0: i32) -> (i32, i32) {
    %c0_i32 = arith.constant 0 : i32
    %c0_i32_0 = arith.constant 0 : i32
    return %arg0, %c0_i32 : i32, i32
  }
  func.func @transform_1(%arg0: i32) -> (i32, i32) {
    %c0_i32 = arith.constant 0 : i32
    %c0_i32_0 = arith.constant 0 : i32
    %c0_i32_1 = arith.constant 0 : i32
    return %c0_i32, %c0_i32_0 : i32, i32
  }
  func.func @transform_2(%arg0: i32) -> (i32, i32) {
    %c0_i32 = arith.constant 0 : i32
    %c0_i32_0 = arith.constant 0 : i32
    %c0_i32_1 = arith.constant 0 : i32
    return %c0_i32, %c0_i32_0 : i32, i32
  }
  func.func @transform_3(%arg0: i32) -> (i32, i32) {
    %c0_i32 = arith.constant 0 : i32
    %c0_i32_0 = arith.constant 0 : i32
    %c0_i32_1 = arith.constant 0 : i32
    return %c0_i32, %c0_i32_0 : i32, i32
  }
  func.func @transform_4(%arg0: i32) -> (i32, i32) {
    %c0_i32 = arith.constant 0 : i32
    %c0_i32_0 = arith.constant 0 : i32
    %c0_i32_1 = arith.constant 0 : i32
    return %c0_i32, %c0_i32_0 : i32, i32
  }
  func.func @transform_5(%arg0: i32) -> (i32, i32) {
    %c0_i32 = arith.constant 0 : i32
    %c0_i32_0 = arith.constant 0 : i32
    %c0_i32_1 = arith.constant 0 : i32
    return %c0_i32, %c0_i32_0 : i32, i32
  }
  func.func @transform_6(%arg0: i32) -> (i32, i32) {
    %c0_i32 = arith.constant 0 : i32
    %c0_i32_0 = arith.constant 0 : i32
    %c0_i32_1 = arith.constant 0 : i32
    return %c0_i32, %c0_i32_0 : i32, i32
  }
  func.func @transform_7(%arg0: i32) -> (i32, i32) {
    %c0_i32 = arith.constant 0 : i32
    %c0_i32_0 = arith.constant 0 : i32
    return %arg0, %c0_i32 : i32, i32
  }
}

</mosaic_0001>

<bundles_post_ra>
// kernel: tpu_custom_call.1
= control target key start
LH: loop header
LB: loop body
LE: loop exit
PB: predicated region body
PF: predicated region fallthrough
CT: control target
= control target key end

     0   :  { %s701_s24 = smov 0   ;;  %s763_s0 = inlined_call_operand.vmem [shape: f32[16,8], index: 0, kind: input, shape index: {}]   ;;  %s764_s1 = inlined_call_operand.vmem [shape: f32[8,32], index: 1, kind: input, shape index: {}]   ;;  %s765_s2 = inlined_call_operand.vmem [shape: f32[1,32], index: 2, kind: input, shape index: {}]   ;;  %s766_s3 = inlined_call_operand.vmem [shape: f32[32,32], index: 3, kind: input, shape index: {}]   ;;  %s767_s4 = inlined_call_operand.vmem [shape: f32[1,32], index: 4, kind: input, shape index: {}]   ;;  %s768_s5 = inlined_call_operand.vmem [shape: f32[32,4], index: 5, kind: input, shape index: {}]   ;;  %s769_s6 = inlined_call_operand.vmem [shape: f32[1,4], index: 6, kind: input, shape index: {}]   ;;  %s770_s7 = inlined_call_operand.vmem [shape: f32[16,4], index: 7, kind: output, shape index: {}]  }
   0x1 LB: > { %s583_s25 = sadd.s32 4294967295, %s657_s24   ;;  %p587_p0 = scmp.ge.s32.totalorder %s657_s24, 1  ;;  %s657_s24 = sphi %s701_s24, %s17_s24  }
   0x2   : > { %p236_p1 = scmp.lt.s32.totalorder %s657_s24, 3 }
   0x4   : > { %p237_p2 = pnand %p587_p0, %p236_p1 }
   0x5   : > { %p266_p3 = scmp.lt.s32.totalorder (!%p237_p2), %s583_s25, 1 }
   0x6   : > { %240 = sbr.rel (%p237_p2) target bundleno = 629 (0x275), region = 48 }
   0xb   : > { %v275_v0 = vld [vmem:[%s764_s1] sm:$0xff]  ;;  %v659_v1 = vmov 0.0   ;;  %vm660_vm0 = vmmov 0   ;;  %s772_s25 = smov (!%p266_p3, %s583_s25), 1  ;;  %vm283_vm1 = vcmask 64512   ;;  %v361_v3 = vld [vmem:[%s766_s3 + $0x18] sm:$0xff] }
   0xc   : > { %610 = vmatprep.subr.mxu0 %v659_v1  ;;  %612 = vmatprep.mubr.msk.f32.mxu0 %vm660_vm0, %v659_v1  ;;  %s588_s28 = sshll.u32 %s772_s25, 3  ;;  %v360_v4 = vld [vmem:[%s766_s3 + $0x10] sm:$0xff]  ;;  %v359_v5 = vld [vmem:[%s766_s3 + $0x8] sm:$0xff]  ;;  %v358_v6 = vld [vmem:[%s766_s3] sm:$0xff]  ;;  %vm369_vm2 = vcmask 261120   ;;  %vm528_vm3 = vcmask 31744  }
   0xd   : > { %611 = vmatpush3.msra.mxu0 %v275_v0  ;;  %615 = vmatprep.subr.mxu1 %v659_v1  ;;  %s269_s8 = scalar_lea.vmem %s763_s0, %s588_s28  ;;  %v590_v7 = vld [vmem:[%s765_s2] ss:$0 sm:$0xff]  ;;  %v447_v12 = vld [vmem:[%s768_s5 + $0x18] sm:$0xff]  ;;  %v446_v13 = vld [vmem:[%s768_s5 + $0x10] sm:$0xff]  ;;  %s273_s13 = scalar_lea.vmem %s770_s7, %s588_s28 }
   0xe   : > { %623 = vmatprep.mubr.msk.f32.mxu1 %vm660_vm0, %v659_v1  ;;  %626 = vmatprep.subr.mxu0 %v659_v1  ;;  %v274_v2 = vld [vmem:[%s269_s8] sm:$0xff]  ;;  %v445_v14 = vld [vmem:[%s768_s5 + $0x8] sm:$0xff] }
   0xf   : > { %613 = vmatmul.mubr.msk.f32.vlgmr.msra.gmra.mxu0 %vm283_vm1, %v274_v2  ;;  %616 = vmatpush3.msra.mxu1 %v361_v3  ;;  %v444_v15 = vld [vmem:[%s768_s5] sm:$0xff] }
  0x10   : > { %634 = vmatprep.mubr.msk.f32.mxu0 %vm660_vm0, %v659_v1  ;;  %617 = vmatprep.subr.mxu1 %v659_v1  ;;  %v592_v16 = vld [vmem:[%s767_s4] ss:$0 sm:$0xff] }
  0x11   : > { %618 = vmatpush3.msra.mxu1 %v360_v4  ;;  %627 = vmatpush3.msra.mxu0 %v447_v12  ;;  %v594_v21 = vld [vmem:[%s769_s6] ss:$0 sm:$0xff] }
  0x12   : > { %619 = vmatprep.subr.mxu1 %v659_v1  ;;  %628 = vmatprep.subr.mxu0 %v659_v1 }
  0x13   : > { %620 = vmatpush3.msra.mxu1 %v359_v5  ;;  %629 = vmatpush3.msra.mxu0 %v446_v13 }
  0x14   : > { %621 = vmatprep.subr.mxu1 %v659_v1  ;;  %630 = vmatprep.subr.mxu0 %v659_v1 }
  0x15   : > { %622 = vmatpush3.msra.mxu1 %v358_v6  ;;  %631 = vmatpush3.msra.mxu0 %v445_v14 }
  0x16   : > { %632 = vmatprep.subr.mxu0 %v659_v1 }
  0x17   : > { %633 = vmatpush3.msra.mxu0 %v444_v15 }
  0xcf   : > { %v353_v8 = vpop.f32.mrf.mxu0 }
  0xd0   : > { %v354_v9 = vadd.f32 %v590_v7, %v353_v8 }
  0xd1   : > { %v614_v10 = vpop.f32.mrf.mxu0 }
  0xd2   : > { %647 = vtanh.f32 %v354_v9 }
  0xdf   : > { %v648_v11 = vpop.eup %647 }
  0xe0   : > { %624 = vmatmul.mubr.msk.f32.vlgmr.msra.gmra.mxu1 %vm369_vm2, %v648_v11 }
 0x1a0   : > { %v439_v17 = vpop.f32.mrf.mxu1 }
 0x1a1   : > { %v440_v18 = vadd.f32 %v592_v16, %v439_v17 }
 0x1a2   : > { %v625_v19 = vpop.f32.mrf.mxu1 }
 0x1a3   : > { %649 = vtanh.f32 %v440_v18 }
 0x1b0   : > { %v650_v20 = vpop.eup %649 }
 0x1b1   : > { %635 = vmatmul.mubr.msk.f32.vlgmr.msra.gmra.mxu0 %vm369_vm2, %v650_v20 }
 0x271   : > { %v524_v22 = vpop.f32.mrf.mxu0 }
 0x272   : > { %v525_v23 = vadd.f32 %v594_v21, %v524_v22 }
 0x273   : > { %v636_v24 = vpop.f32.mrf.mxu0 }
 0x274   : > { %529 = vst.msk [vmem:[%s273_s13] sm:$0xff] %vm528_vm3, %v525_v23 }
 0x275 PF: > { %s17_s24 = sadd.s32 1, %s657_s24  }
 0x276   : > { %p14_p4 = scmp.ge.s32.totalorder %s17_s24, 4  }
 0x278   :  { %16 = sbr.rel (!%p14_p4) target bundleno = 1 (0x1), region = 78 }

</bundles_post_ra>
